<compile_context>
chip_gen: v7x
topology: tpu7x:2x2x1
jax: 0.10.0
libtpu: 0.0.40
codegen_flags: <defaults>
</compile_context>

<pallas_src>
import functools

import jax
import jax.numpy as jnp
from jax.experimental import pallas as pl
from jax.experimental.pallas import tpu as pltpu

_LANE = 128
_SUB = 8
_TN_MAX = 1024   # vreg-pressure bound (acc + pd + ld + rows ~ 4*tn/128 vregs)
_TM_MAX = 2048   # per-step work >> per-grid-step overhead


def _round_up(x: int, m: int) -> int:
    return (x + m - 1) // m * m


def _ceil_div(a: int, b: int) -> int:
    return -(-a // b)


def _choose_tiles(n: int):
    """Pick (tm, tn, m_pad, k_pad, num_i, num_j) with balanced, minimal padding."""
    # Column / reduction axis (lanes).
    num_j = max(1, _ceil_div(n, _TN_MAX))
    tn = _round_up(_ceil_div(n, num_j), _LANE)
    k_pad = num_j * tn
    # Row / parallel axis (sublanes).  Keep num_i >= 2 (and even) for larger N
    # so v7x's two TensorCores both get work on the "parallel" grid axis.
    if n <= 512:
        num_i = 1
    else:
        num_i = max(2, _ceil_div(n, _TM_MAX))
        num_i += num_i % 2
    tm = _round_up(_ceil_div(n, num_i), _SUB)
    m_pad = num_i * tm
    return tm, tn, m_pad, k_pad, num_i, num_j


def _rank_mse_kernel(pred_col_ref, label_col_ref, pred_row_ref, label_row_ref,
                     out_ref, *, n: int, tm: int, tn: int, sub: int,
                     rank_weight: float, mse_weight: float, unroll):
    i = pl.program_id(0)
    j = pl.program_id(1)

    pred_row = pred_row_ref[...]      # (1, tn)  lane-dense
    label_row = label_row_ref[...]    # (1, tn)

    inv_n = jnp.float32(1.0 / n)
    rank_scale = jnp.float32(rank_weight) * inv_n
    # The MSE contribution is broadcast over the `sub` output sublanes, so it is
    # pre-divided by `sub` to keep the store a full, unmasked (sub, tn) tile.
    mse_scale = jnp.float32(mse_weight) * inv_n / jnp.float32(sub)

    @pl.when(j == 0)
    def _init():
        out_ref[...] = jnp.zeros_like(out_ref)

    # Minimal 5-VALU-op strip body; no masking anywhere (pad values are chosen
    # in the wrapper so the relu kills every pad contribution exactly).
    def strip_body(s, acc):
        r0 = pl.multiple_of(s * sub, sub)
        p_r = pred_col_ref[pl.ds(r0, sub), :]    # (sub, 1)
        l_r = label_col_ref[pl.ds(r0, sub), :]   # (sub, 1)
        pd = p_r - pred_row                      # (sub, tn)
        ld = label_row - l_r                     # sign folded -> no extra vneg
        return acc + jnp.maximum(pd * ld, jnp.float32(0.0))

    acc0 = jnp.zeros((sub, tn), jnp.float32)
    acc8 = jax.lax.fori_loop(0, tm // sub, strip_body, acc0, unroll=unroll)

    out_ref[...] += rank_scale * acc8

    @pl.when(i == 0)
    def _mse():
        d = pred_row - label_row                 # exactly zero on pad lanes
        out_ref[...] += mse_scale * (d * d)


def rank_mse_loss(pred: jax.Array, label: jax.Array,
                  rank_weight: float = 3.0, mse_weight: float = 1.0) -> jax.Array:
    """Pallas TPU implementation of RankMSELoss.forward for 1-D pred/label."""
    assert pred.ndim == 1 and pred.shape == label.shape
    n = int(pred.shape[0])
    pred = pred.astype(jnp.float32)
    label = label.astype(jnp.float32)

    tm, tn, m_pad, k_pad, num_i, num_j = _choose_tiles(n)

    # Mask-free padding: with C >= max(pred) and C >= max(label), every
    # real/pad pair product (p_r - C)(C - l_c) <= 0 so relu(.) == 0 exactly,
    # pad/pad pairs difference to 0, and MSE pad lanes give C - C = 0.
    if m_pad != n or k_pad != n:
        big = jnp.maximum(jnp.max(pred), jnp.max(label))
        pred_row = jnp.full((1, k_pad), big, jnp.float32).at[0, :n].set(pred)
        label_row = jnp.full((1, k_pad), big, jnp.float32).at[0, :n].set(label)
        pred_col = jnp.full((m_pad, 1), big, jnp.float32).at[:n, 0].set(pred)
        label_col = jnp.full((m_pad, 1), big, jnp.float32).at[:n, 0].set(label)
    else:
        pred_row = pred.reshape(1, k_pad)
        label_row = label.reshape(1, k_pad)
        pred_col = pred.reshape(m_pad, 1)
        label_col = label.reshape(m_pad, 1)

    strips = tm // _SUB
    unroll = True if strips <= 16 else 8

    kernel = functools.partial(
        _rank_mse_kernel, n=n, tm=tm, tn=tn, sub=_SUB,
        rank_weight=float(rank_weight), mse_weight=float(mse_weight),
        unroll=unroll)

    grid_spec = pltpu.PrefetchScalarGridSpec(
        num_scalar_prefetch=0,
        grid=(num_i, num_j),
        in_specs=[
            pl.BlockSpec((tm, 1), lambda i, j: (i, 0)),   # pred  column view
            pl.BlockSpec((tm, 1), lambda i, j: (i, 0)),   # label column view
            pl.BlockSpec((1, tn), lambda i, j: (0, j)),   # pred  row view
            pl.BlockSpec((1, tn), lambda i, j: (0, j)),   # label row view
        ],
        out_specs=pl.BlockSpec((_SUB, tn), lambda i, j: (i, 0)),
    )

    partials = pl.pallas_call(
        kernel,
        out_shape=jax.ShapeDtypeStruct((num_i * _SUB, tn), jnp.float32),
        grid_spec=grid_spec,
        compiler_params=pltpu.CompilerParams(
            dimension_semantics=("parallel", "arbitrary")),
        cost_estimate=pl.CostEstimate(
            flops=5 * m_pad * k_pad + 3 * k_pad,
            transcendentals=0,
            bytes_accessed=4 * (2 * m_pad + 2 * num_i * k_pad
                                + num_i * _SUB * tn)),
    )(pred_col, label_col, pred_row, label_row)

    # Tiny final reduction of the lane-dense partial-sum slab.
    return jnp.sum(partials)


def _reference(pred, label, rank_weight=3.0, mse_weight=1.0):
    pred = pred.astype(jnp.float32)
    label = label.astype(jnp.float32)
    mse_loss = jnp.mean((pred - label) ** 2)
    pred_diff = pred[:, None] - pred[None, :]
    label_diff = label[:, None] - label[None, :]
    rank_loss = jnp.mean(
        jnp.sum(jnp.maximum(-(pred_diff * label_diff), 0.0), axis=1))
    return rank_weight * rank_loss + mse_weight * mse_loss


if __name__ == "__main__":
    key = jax.random.PRNGKey(0)

    def _check(n, k):
        k1, k2 = jax.random.split(k)
        pred = jax.random.normal(k1, (n,), dtype=jnp.float32)
        label = jax.random.normal(k2, (n,), dtype=jnp.float32)
        loss = jax.block_until_ready(rank_mse_loss(pred, label))
        ref = _reference(pred, label)
        assert jnp.allclose(loss, ref, rtol=1e-4, atol=1e-4), (n, loss, ref)

    k1, k2, k3 = jax.random.split(key, 3)
    _check(128, k1)    # aligned, single tile
    _check(200, k2)    # unaligned single tile (exercises mask-free padding)
    _check(1300, k3)   # 2x2 grid: both row and column padding + accumulation

    print("KERNEL_OK")
</pallas_src>

<mosaic_0001>
module attributes {stable_mosaic.version = 11 : i64} {
  func.func @_rank_mse_kernel(%arg0: i32, %arg1: i32, %arg2: memref<128x1xf32, #tpu.memory_space<vmem>>, %arg3: memref<128x1xf32, #tpu.memory_space<vmem>>, %arg4: memref<1x128xf32, #tpu.memory_space<vmem>>, %arg5: memref<1x128xf32, #tpu.memory_space<vmem>>, %arg6: memref<8x128xf32, #tpu.memory_space<vmem>>) attributes {dimension_semantics = [#tpu.dimension_semantics<parallel>, #tpu.dimension_semantics<arbitrary>], iteration_bounds = array<i64: 1, 1>, scalar_prefetch = 0 : i64, scratch_operands = 0 : i64, tpu.core_type = #tpu.core_type<tc>, window_params = [{transform_indices = @transform_0, window_bounds = array<i64: 128, 1>}, {transform_indices = @transform_1, window_bounds = array<i64: 128, 1>}, {transform_indices = @transform_2, window_bounds = array<i64: 1, 128>}, {transform_indices = @transform_3, window_bounds = array<i64: 1, 128>}, {transform_indices = @transform_4, window_bounds = array<i64: 8, 128>}]} {
    %c0 = arith.constant 0 : index
    %c0_0 = arith.constant 0 : index
    %0 = vector.load %arg4[%c0, %c0_0] : memref<1x128xf32, #tpu.memory_space<vmem>>, vector<1x128xf32>
    %c0_1 = arith.constant 0 : index
    %c0_2 = arith.constant 0 : index
    %1 = vector.load %arg5[%c0_1, %c0_2] : memref<1x128xf32, #tpu.memory_space<vmem>>, vector<1x128xf32>
    %cst = arith.constant 3.000000e+00 : f32
    %cst_3 = arith.constant 7.812500e-03 : f32
    %2 = arith.mulf %cst, %cst_3 : f32
    %cst_4 = arith.constant 1.000000e+00 : f32
    %cst_5 = arith.constant 7.812500e-03 : f32
    %3 = arith.mulf %cst_4, %cst_5 : f32
    %cst_6 = arith.constant 8.000000e+00 : f32
    %4 = arith.divf %3, %cst_6 : f32
    %c0_i32 = arith.constant 0 : i32
    %5 = arith.cmpi eq, %arg1, %c0_i32 : i32
    %6 = arith.extui %5 : i1 to i32
    %c0_i32_7 = arith.constant 0 : i32
    %7 = arith.cmpi ne, %6, %c0_i32_7 : i32
    scf.if %7 {
      %cst_80 = arith.constant 0.000000e+00 : f32
      %273 = vector.broadcast %cst_80 : f32 to vector<8x128xf32>
      %c0_81 = arith.constant 0 : index
      %c0_82 = arith.constant 0 : index
      %274 = vector.load %arg6[%c0_81, %c0_82] : memref<8x128xf32, #tpu.memory_space<vmem>>, vector<8x128xf32>
      tpu.vector_store %arg6[%c0_81, %c0_82], %273 {strides = array<i32>} : memref<8x128xf32, #tpu.memory_space<vmem>>, vector<8x128xf32>,
    } else {
    }
    %cst_8 = arith.constant 0.000000e+00 : f32
    %8 = vector.broadcast %cst_8 : f32 to vector<8x128xf32>
    %c0_i32_9 = arith.constant 0 : i32
    %c8_i32 = arith.constant 8 : i32
    %9 = arith.muli %c0_i32_9, %c8_i32 : i32
    %10 = tpu.assume_multiple %9, 8 : i32
    %11 = arith.index_cast %10 : i32 to index
    %c0_10 = arith.constant 0 : index
    %12 = vector.load %arg2[%11, %c0_10] : memref<128x1xf32, #tpu.memory_space<vmem>>, vector<8x1xf32>
    %13 = arith.index_cast %10 : i32 to index
    %c0_11 = arith.constant 0 : index
    %14 = vector.load %arg3[%13, %c0_11] : memref<128x1xf32, #tpu.memory_space<vmem>>, vector<8x1xf32>
    %15 = vector.broadcast %12 : vector<8x1xf32> to vector<8x128xf32>
    %16 = vector.broadcast %0 : vector<1x128xf32> to vector<8x128xf32>
    %17 = arith.subf %15, %16 : vector<8x128xf32>
    %18 = vector.broadcast %1 : vector<1x128xf32> to vector<8x128xf32>
    %19 = vector.broadcast %14 : vector<8x1xf32> to vector<8x128xf32>
    %20 = arith.subf %18, %19 : vector<8x128xf32>
    %21 = arith.mulf %17, %20 : vector<8x128xf32>
    %cst_12 = arith.constant 0.000000e+00 : f32
    %22 = vector.broadcast %cst_12 : f32 to vector<8x128xf32>
    %23 = arith.maximumf %21, %22 : vector<8x128xf32>
    %24 = arith.addf %8, %23 : vector<8x128xf32>
    %c1_i32 = arith.constant 1 : i32
    %c8_i32_13 = arith.constant 8 : i32
    %25 = arith.muli %c1_i32, %c8_i32_13 : i32
    %26 = tpu.assume_multiple %25, 8 : i32
    %27 = arith.index_cast %26 : i32 to index
    %c0_14 = arith.constant 0 : index
    %28 = vector.load %arg2[%27, %c0_14] : memref<128x1xf32, #tpu.memory_space<vmem>>, vector<8x1xf32>
    %29 = arith.index_cast %26 : i32 to index
    %c0_15 = arith.constant 0 : index
    %30 = vector.load %arg3[%29, %c0_15] : memref<128x1xf32, #tpu.memory_space<vmem>>, vector<8x1xf32>
    %31 = vector.broadcast %28 : vector<8x1xf32> to vector<8x128xf32>
    %32 = vector.broadcast %0 : vector<1x128xf32> to vector<8x128xf32>
    %33 = arith.subf %31, %32 : vector<8x128xf32>
    %34 = vector.broadcast %1 : vector<1x128xf32> to vector<8x128xf32>
    %35 = vector.broadcast %30 : vector<8x1xf32> to vector<8x128xf32>
    %36 = arith.subf %34, %35 : vector<8x128xf32>
    %37 = arith.mulf %33, %36 : vector<8x128xf32>
    %cst_16 = arith.constant 0.000000e+00 : f32
    %38 = vector.broadcast %cst_16 : f32 to vector<8x128xf32>
    %39 = arith.maximumf %37, %38 : vector<8x128xf32>
    %40 = arith.addf %24, %39 : vector<8x128xf32>
    %c2_i32 = arith.constant 2 : i32
    %c8_i32_17 = arith.constant 8 : i32
    %41 = arith.muli %c2_i32, %c8_i32_17 : i32
    %42 = tpu.assume_multiple %41, 8 : i32
    %43 = arith.index_cast %42 : i32 to index
    %c0_18 = arith.constant 0 : index
    %44 = vector.load %arg2[%43, %c0_18] : memref<128x1xf32, #tpu.memory_space<vmem>>, vector<8x1xf32>
    %45 = arith.index_cast %42 : i32 to index
    %c0_19 = arith.constant 0 : index
    %46 = vector.load %arg3[%45, %c0_19] : memref<128x1xf32, #tpu.memory_space<vmem>>, vector<8x1xf32>
    %47 = vector.broadcast %44 : vector<8x1xf32> to vector<8x128xf32>
    %48 = vector.broadcast %0 : vector<1x128xf32> to vector<8x128xf32>
    %49 = arith.subf %47, %48 : vector<8x128xf32>
    %50 = vector.broadcast %1 : vector<1x128xf32> to vector<8x128xf32>
    %51 = vector.broadcast %46 : vector<8x1xf32> to vector<8x128xf32>
    %52 = arith.subf %50, %51 : vector<8x128xf32>
    %53 = arith.mulf %49, %52 : vector<8x128xf32>
    %cst_20 = arith.constant 0.000000e+00 : f32
    %54 = vector.broadcast %cst_20 : f32 to vector<8x128xf32>
    %55 = arith.maximumf %53, %54 : vector<8x128xf32>
    %56 = arith.addf %40, %55 : vector<8x128xf32>
    %c3_i32 = arith.constant 3 : i32
    %c8_i32_21 = arith.constant 8 : i32
    %57 = arith.muli %c3_i32, %c8_i32_21 : i32
    %58 = tpu.assume_multiple %57, 8 : i32
    %59 = arith.index_cast %58 : i32 to index
    %c0_22 = arith.constant 0 : index
    %60 = vector.load %arg2[%59, %c0_22] : memref<128x1xf32, #tpu.memory_space<vmem>>, vector<8x1xf32>
    %61 = arith.index_cast %58 : i32 to index
    %c0_23 = arith.constant 0 : index
    %62 = vector.load %arg3[%61, %c0_23] : memref<128x1xf32, #tpu.memory_space<vmem>>, vector<8x1xf32>
    %63 = vector.broadcast %60 : vector<8x1xf32> to vector<8x128xf32>
    %64 = vector.broadcast %0 : vector<1x128xf32> to vector<8x128xf32>
    %65 = arith.subf %63, %64 : vector<8x128xf32>
    %66 = vector.broadcast %1 : vector<1x128xf32> to vector<8x128xf32>
    %67 = vector.broadcast %62 : vector<8x1xf32> to vector<8x128xf32>
    %68 = arith.subf %66, %67 : vector<8x128xf32>
    %69 = arith.mulf %65, %68 : vector<8x128xf32>
    %cst_24 = arith.constant 0.000000e+00 : f32
    %70 = vector.broadcast %cst_24 : f32 to vector<8x128xf32>
    %71 = arith.maximumf %69, %70 : vector<8x128xf32>
    %72 = arith.addf %56, %71 : vector<8x128xf32>
    %c4_i32 = arith.constant 4 : i32
    %c8_i32_25 = arith.constant 8 : i32
    %73 = arith.muli %c4_i32, %c8_i32_25 : i32
    %74 = tpu.assume_multiple %73, 8 : i32
    %75 = arith.index_cast %74 : i32 to index
    %c0_26 = arith.constant 0 : index
    %76 = vector.load %arg2[%75, %c0_26] : memref<128x1xf32, #tpu.memory_space<vmem>>, vector<8x1xf32>
    %77 = arith.index_cast %74 : i32 to index
    %c0_27 = arith.constant 0 : index
    %78 = vector.load %arg3[%77, %c0_27] : memref<128x1xf32, #tpu.memory_space<vmem>>, vector<8x1xf32>
    %79 = vector.broadcast %76 : vector<8x1xf32> to vector<8x128xf32>
    %80 = vector.broadcast %0 : vector<1x128xf32> to vector<8x128xf32>
    %81 = arith.subf %79, %80 : vector<8x128xf32>
    %82 = vector.broadcast %1 : vector<1x128xf32> to vector<8x128xf32>
    %83 = vector.broadcast %78 : vector<8x1xf32> to vector<8x128xf32>
    %84 = arith.subf %82, %83 : vector<8x128xf32>
    %85 = arith.mulf %81, %84 : vector<8x128xf32>
    %cst_28 = arith.constant 0.000000e+00 : f32
    %86 = vector.broadcast %cst_28 : f32 to vector<8x128xf32>
    %87 = arith.maximumf %85, %86 : vector<8x128xf32>
    %88 = arith.addf %72, %87 : vector<8x128xf32>
    %c5_i32 = arith.constant 5 : i32
    %c8_i32_29 = arith.constant 8 : i32
    %89 = arith.muli %c5_i32, %c8_i32_29 : i32
    %90 = tpu.assume_multiple %89, 8 : i32
    %91 = arith.index_cast %90 : i32 to index
    %c0_30 = arith.constant 0 : index
    %92 = vector.load %arg2[%91, %c0_30] : memref<128x1xf32, #tpu.memory_space<vmem>>, vector<8x1xf32>
    %93 = arith.index_cast %90 : i32 to index
    %c0_31 = arith.constant 0 : index
    %94 = vector.load %arg3[%93, %c0_31] : memref<128x1xf32, #tpu.memory_space<vmem>>, vector<8x1xf32>
    %95 = vector.broadcast %92 : vector<8x1xf32> to vector<8x128xf32>
    %96 = vector.broadcast %0 : vector<1x128xf32> to vector<8x128xf32>
    %97 = arith.subf %95, %96 : vector<8x128xf32>
    %98 = vector.broadcast %1 : vector<1x128xf32> to vector<8x128xf32>
    %99 = vector.broadcast %94 : vector<8x1xf32> to vector<8x128xf32>
    %100 = arith.subf %98, %99 : vector<8x128xf32>
    %101 = arith.mulf %97, %100 : vector<8x128xf32>
    %cst_32 = arith.constant 0.000000e+00 : f32
    %102 = vector.broadcast %cst_32 : f32 to vector<8x128xf32>
    %103 = arith.maximumf %101, %102 : vector<8x128xf32>
    %104 = arith.addf %88, %103 : vector<8x128xf32>
    %c6_i32 = arith.constant 6 : i32
    %c8_i32_33 = arith.constant 8 : i32
    %105 = arith.muli %c6_i32, %c8_i32_33 : i32
    %106 = tpu.assume_multiple %105, 8 : i32
    %107 = arith.index_cast %106 : i32 to index
    %c0_34 = arith.constant 0 : index
    %108 = vector.load %arg2[%107, %c0_34] : memref<128x1xf32, #tpu.memory_space<vmem>>, vector<8x1xf32>
    %109 = arith.index_cast %106 : i32 to index
    %c0_35 = arith.constant 0 : index
    %110 = vector.load %arg3[%109, %c0_35] : memref<128x1xf32, #tpu.memory_space<vmem>>, vector<8x1xf32>
    %111 = vector.broadcast %108 : vector<8x1xf32> to vector<8x128xf32>
    %112 = vector.broadcast %0 : vector<1x128xf32> to vector<8x128xf32>
    %113 = arith.subf %111, %112 : vector<8x128xf32>
    %114 = vector.broadcast %1 : vector<1x128xf32> to vector<8x128xf32>
    %115 = vector.broadcast %110 : vector<8x1xf32> to vector<8x128xf32>
    %116 = arith.subf %114, %115 : vector<8x128xf32>
    %117 = arith.mulf %113, %116 : vector<8x128xf32>
    %cst_36 = arith.constant 0.000000e+00 : f32
    %118 = vector.broadcast %cst_36 : f32 to vector<8x128xf32>
    %119 = arith.maximumf %117, %118 : vector<8x128xf32>
    %120 = arith.addf %104, %119 : vector<8x128xf32>
    %c7_i32 = arith.constant 7 : i32
    %c8_i32_37 = arith.constant 8 : i32
    %121 = arith.muli %c7_i32, %c8_i32_37 : i32
    %122 = tpu.assume_multiple %121, 8 : i32
    %123 = arith.index_cast %122 : i32 to index
    %c0_38 = arith.constant 0 : index
    %124 = vector.load %arg2[%123, %c0_38] : memref<128x1xf32, #tpu.memory_space<vmem>>, vector<8x1xf32>
    %125 = arith.index_cast %122 : i32 to index
    %c0_39 = arith.constant 0 : index
    %126 = vector.load %arg3[%125, %c0_39] : memref<128x1xf32, #tpu.memory_space<vmem>>, vector<8x1xf32>
    %127 = vector.broadcast %124 : vector<8x1xf32> to vector<8x128xf32>
    %128 = vector.broadcast %0 : vector<1x128xf32> to vector<8x128xf32>
    %129 = arith.subf %127, %128 : vector<8x128xf32>
    %130 = vector.broadcast %1 : vector<1x128xf32> to vector<8x128xf32>
    %131 = vector.broadcast %126 : vector<8x1xf32> to vector<8x128xf32>
    %132 = arith.subf %130, %131 : vector<8x128xf32>
    %133 = arith.mulf %129, %132 : vector<8x128xf32>
    %cst_40 = arith.constant 0.000000e+00 : f32
    %134 = vector.broadcast %cst_40 : f32 to vector<8x128xf32>
    %135 = arith.maximumf %133, %134 : vector<8x128xf32>
    %136 = arith.addf %120, %135 : vector<8x128xf32>
    %c8_i32_41 = arith.constant 8 : i32
    %c8_i32_42 = arith.constant 8 : i32
    %137 = arith.muli %c8_i32_41, %c8_i32_42 : i32
    %138 = tpu.assume_multiple %137, 8 : i32
    %139 = arith.index_cast %138 : i32 to index
    %c0_43 = arith.constant 0 : index
    %140 = vector.load %arg2[%139, %c0_43] : memref<128x1xf32, #tpu.memory_space<vmem>>, vector<8x1xf32>
    %141 = arith.index_cast %138 : i32 to index
    %c0_44 = arith.constant 0 : index
    %142 = vector.load %arg3[%141, %c0_44] : memref<128x1xf32, #tpu.memory_space<vmem>>, vector<8x1xf32>
    %143 = vector.broadcast %140 : vector<8x1xf32> to vector<8x128xf32>
    %144 = vector.broadcast %0 : vector<1x128xf32> to vector<8x128xf32>
    %145 = arith.subf %143, %144 : vector<8x128xf32>
    %146 = vector.broadcast %1 : vector<1x128xf32> to vector<8x128xf32>
    %147 = vector.broadcast %142 : vector<8x1xf32> to vector<8x128xf32>
    %148 = arith.subf %146, %147 : vector<8x128xf32>
    %149 = arith.mulf %145, %148 : vector<8x128xf32>
    %cst_45 = arith.constant 0.000000e+00 : f32
    %150 = vector.broadcast %cst_45 : f32 to vector<8x128xf32>
    %151 = arith.maximumf %149, %150 : vector<8x128xf32>
    %152 = arith.addf %136, %151 : vector<8x128xf32>
    %c9_i32 = arith.constant 9 : i32
    %c8_i32_46 = arith.constant 8 : i32
    %153 = arith.muli %c9_i32, %c8_i32_46 : i32
    %154 = tpu.assume_multiple %153, 8 : i32
    %155 = arith.index_cast %154 : i32 to index
    %c0_47 = arith.constant 0 : index
    %156 = vector.load %arg2[%155, %c0_47] : memref<128x1xf32, #tpu.memory_space<vmem>>, vector<8x1xf32>
    %157 = arith.index_cast %154 : i32 to index
    %c0_48 = arith.constant 0 : index
    %158 = vector.load %arg3[%157, %c0_48] : memref<128x1xf32, #tpu.memory_space<vmem>>, vector<8x1xf32>
    %159 = vector.broadcast %156 : vector<8x1xf32> to vector<8x128xf32>
    %160 = vector.broadcast %0 : vector<1x128xf32> to vector<8x128xf32>
    %161 = arith.subf %159, %160 : vector<8x128xf32>
    %162 = vector.broadcast %1 : vector<1x128xf32> to vector<8x128xf32>
    %163 = vector.broadcast %158 : vector<8x1xf32> to vector<8x128xf32>
    %164 = arith.subf %162, %163 : vector<8x128xf32>
    %165 = arith.mulf %161, %164 : vector<8x128xf32>
    %cst_49 = arith.constant 0.000000e+00 : f32
    %166 = vector.broadcast %cst_49 : f32 to vector<8x128xf32>
    %167 = arith.maximumf %165, %166 : vector<8x128xf32>
    %168 = arith.addf %152, %167 : vector<8x128xf32>
    %c10_i32 = arith.constant 10 : i32
    %c8_i32_50 = arith.constant 8 : i32
    %169 = arith.muli %c10_i32, %c8_i32_50 : i32
    %170 = tpu.assume_multiple %169, 8 : i32
    %171 = arith.index_cast %170 : i32 to index
    %c0_51 = arith.constant 0 : index
    %172 = vector.load %arg2[%171, %c0_51] : memref<128x1xf32, #tpu.memory_space<vmem>>, vector<8x1xf32>
    %173 = arith.index_cast %170 : i32 to index
    %c0_52 = arith.constant 0 : index
    %174 = vector.load %arg3[%173, %c0_52] : memref<128x1xf32, #tpu.memory_space<vmem>>, vector<8x1xf32>
    %175 = vector.broadcast %172 : vector<8x1xf32> to vector<8x128xf32>
    %176 = vector.broadcast %0 : vector<1x128xf32> to vector<8x128xf32>
    %177 = arith.subf %175, %176 : vector<8x128xf32>
    %178 = vector.broadcast %1 : vector<1x128xf32> to vector<8x128xf32>
    %179 = vector.broadcast %174 : vector<8x1xf32> to vector<8x128xf32>
    %180 = arith.subf %178, %179 : vector<8x128xf32>
    %181 = arith.mulf %177, %180 : vector<8x128xf32>
    %cst_53 = arith.constant 0.000000e+00 : f32
    %182 = vector.broadcast %cst_53 : f32 to vector<8x128xf32>
    %183 = arith.maximumf %181, %182 : vector<8x128xf32>
    %184 = arith.addf %168, %183 : vector<8x128xf32>
    %c11_i32 = arith.constant 11 : i32
    %c8_i32_54 = arith.constant 8 : i32
    %185 = arith.muli %c11_i32, %c8_i32_54 : i32
    %186 = tpu.assume_multiple %185, 8 : i32
    %187 = arith.index_cast %186 : i32 to index
    %c0_55 = arith.constant 0 : index
    %188 = vector.load %arg2[%187, %c0_55] : memref<128x1xf32, #tpu.memory_space<vmem>>, vector<8x1xf32>
    %189 = arith.index_cast %186 : i32 to index
    %c0_56 = arith.constant 0 : index
    %190 = vector.load %arg3[%189, %c0_56] : memref<128x1xf32, #tpu.memory_space<vmem>>, vector<8x1xf32>
    %191 = vector.broadcast %188 : vector<8x1xf32> to vector<8x128xf32>
    %192 = vector.broadcast %0 : vector<1x128xf32> to vector<8x128xf32>
    %193 = arith.subf %191, %192 : vector<8x128xf32>
    %194 = vector.broadcast %1 : vector<1x128xf32> to vector<8x128xf32>
    %195 = vector.broadcast %190 : vector<8x1xf32> to vector<8x128xf32>
    %196 = arith.subf %194, %195 : vector<8x128xf32>
    %197 = arith.mulf %193, %196 : vector<8x128xf32>
    %cst_57 = arith.constant 0.000000e+00 : f32
    %198 = vector.broadcast %cst_57 : f32 to vector<8x128xf32>
    %199 = arith.maximumf %197, %198 : vector<8x128xf32>
    %200 = arith.addf %184, %199 : vector<8x128xf32>
    %c12_i32 = arith.constant 12 : i32
    %c8_i32_58 = arith.constant 8 : i32
    %201 = arith.muli %c12_i32, %c8_i32_58 : i32
    %202 = tpu.assume_multiple %201, 8 : i32
    %203 = arith.index_cast %202 : i32 to index
    %c0_59 = arith.constant 0 : index
    %204 = vector.load %arg2[%203, %c0_59] : memref<128x1xf32, #tpu.memory_space<vmem>>, vector<8x1xf32>
    %205 = arith.index_cast %202 : i32 to index
    %c0_60 = arith.constant 0 : index
    %206 = vector.load %arg3[%205, %c0_60] : memref<128x1xf32, #tpu.memory_space<vmem>>, vector<8x1xf32>
    %207 = vector.broadcast %204 : vector<8x1xf32> to vector<8x128xf32>
    %208 = vector.broadcast %0 : vector<1x128xf32> to vector<8x128xf32>
    %209 = arith.subf %207, %208 : vector<8x128xf32>
    %210 = vector.broadcast %1 : vector<1x128xf32> to vector<8x128xf32>
    %211 = vector.broadcast %206 : vector<8x1xf32> to vector<8x128xf32>
    %212 = arith.subf %210, %211 : vector<8x128xf32>
    %213 = arith.mulf %209, %212 : vector<8x128xf32>
    %cst_61 = arith.constant 0.000000e+00 : f32
    %214 = vector.broadcast %cst_61 : f32 to vector<8x128xf32>
    %215 = arith.maximumf %213, %214 : vector<8x128xf32>
    %216 = arith.addf %200, %215 : vector<8x128xf32>
    %c13_i32 = arith.constant 13 : i32
    %c8_i32_62 = arith.constant 8 : i32
    %217 = arith.muli %c13_i32, %c8_i32_62 : i32
    %218 = tpu.assume_multiple %217, 8 : i32
    %219 = arith.index_cast %218 : i32 to index
    %c0_63 = arith.constant 0 : index
    %220 = vector.load %arg2[%219, %c0_63] : memref<128x1xf32, #tpu.memory_space<vmem>>, vector<8x1xf32>
    %221 = arith.index_cast %218 : i32 to index
    %c0_64 = arith.constant 0 : index
    %222 = vector.load %arg3[%221, %c0_64] : memref<128x1xf32, #tpu.memory_space<vmem>>, vector<8x1xf32>
    %223 = vector.broadcast %220 : vector<8x1xf32> to vector<8x128xf32>
    %224 = vector.broadcast %0 : vector<1x128xf32> to vector<8x128xf32>
    %225 = arith.subf %223, %224 : vector<8x128xf32>
    %226 = vector.broadcast %1 : vector<1x128xf32> to vector<8x128xf32>
    %227 = vector.broadcast %222 : vector<8x1xf32> to vector<8x128xf32>
    %228 = arith.subf %226, %227 : vector<8x128xf32>
    %229 = arith.mulf %225, %228 : vector<8x128xf32>
    %cst_65 = arith.constant 0.000000e+00 : f32
    %230 = vector.broadcast %cst_65 : f32 to vector<8x128xf32>
    %231 = arith.maximumf %229, %230 : vector<8x128xf32>
    %232 = arith.addf %216, %231 : vector<8x128xf32>
    %c14_i32 = arith.constant 14 : i32
    %c8_i32_66 = arith.constant 8 : i32
    %233 = arith.muli %c14_i32, %c8_i32_66 : i32
    %234 = tpu.assume_multiple %233, 8 : i32
    %235 = arith.index_cast %234 : i32 to index
    %c0_67 = arith.constant 0 : index
    %236 = vector.load %arg2[%235, %c0_67] : memref<128x1xf32, #tpu.memory_space<vmem>>, vector<8x1xf32>
    %237 = arith.index_cast %234 : i32 to index
    %c0_68 = arith.constant 0 : index
    %238 = vector.load %arg3[%237, %c0_68] : memref<128x1xf32, #tpu.memory_space<vmem>>, vector<8x1xf32>
    %239 = vector.broadcast %236 : vector<8x1xf32> to vector<8x128xf32>
    %240 = vector.broadcast %0 : vector<1x128xf32> to vector<8x128xf32>
    %241 = arith.subf %239, %240 : vector<8x128xf32>
    %242 = vector.broadcast %1 : vector<1x128xf32> to vector<8x128xf32>
    %243 = vector.broadcast %238 : vector<8x1xf32> to vector<8x128xf32>
    %244 = arith.subf %242, %243 : vector<8x128xf32>
    %245 = arith.mulf %241, %244 : vector<8x128xf32>
    %cst_69 = arith.constant 0.000000e+00 : f32
    %246 = vector.broadcast %cst_69 : f32 to vector<8x128xf32>
    %247 = arith.maximumf %245, %246 : vector<8x128xf32>
    %248 = arith.addf %232, %247 : vector<8x128xf32>
    %c15_i32 = arith.constant 15 : i32
    %c8_i32_70 = arith.constant 8 : i32
    %249 = arith.muli %c15_i32, %c8_i32_70 : i32
    %250 = tpu.assume_multiple %249, 8 : i32
    %251 = arith.index_cast %250 : i32 to index
    %c0_71 = arith.constant 0 : index
    %252 = vector.load %arg2[%251, %c0_71] : memref<128x1xf32, #tpu.memory_space<vmem>>, vector<8x1xf32>
    %253 = arith.index_cast %250 : i32 to index
    %c0_72 = arith.constant 0 : index
    %254 = vector.load %arg3[%253, %c0_72] : memref<128x1xf32, #tpu.memory_space<vmem>>, vector<8x1xf32>
    %255 = vector.broadcast %252 : vector<8x1xf32> to vector<8x128xf32>
    %256 = vector.broadcast %0 : vector<1x128xf32> to vector<8x128xf32>
    %257 = arith.subf %255, %256 : vector<8x128xf32>
    %258 = vector.broadcast %1 : vector<1x128xf32> to vector<8x128xf32>
    %259 = vector.broadcast %254 : vector<8x1xf32> to vector<8x128xf32>
    %260 = arith.subf %258, %259 : vector<8x128xf32>
    %261 = arith.mulf %257, %260 : vector<8x128xf32>
    %cst_73 = arith.constant 0.000000e+00 : f32
    %262 = vector.broadcast %cst_73 : f32 to vector<8x128xf32>
    %263 = arith.maximumf %261, %262 : vector<8x128xf32>
    %264 = arith.addf %248, %263 : vector<8x128xf32>
    %c16_i32 = arith.constant 16 : i32
    %c0_74 = arith.constant 0 : index
    %c0_75 = arith.constant 0 : index
    %265 = vector.load %arg6[%c0_74, %c0_75] : memref<8x128xf32, #tpu.memory_space<vmem>>, vector<8x128xf32>
    %266 = vector.broadcast %2 : f32 to vector<8x128xf32>
    %267 = arith.mulf %266, %264 : vector<8x128xf32>
    %268 = arith.addf %265, %267 : vector<8x128xf32>
    %c0_76 = arith.constant 0 : index
    %c0_77 = arith.constant 0 : index
    %269 = vector.load %arg6[%c0_76, %c0_77] : memref<8x128xf32, #tpu.memory_space<vmem>>, vector<8x128xf32>
    tpu.vector_store %arg6[%c0_76, %c0_77], %268 {strides = array<i32>} : memref<8x128xf32, #tpu.memory_space<vmem>>, vector<8x128xf32>,
    %c0_i32_78 = arith.constant 0 : i32
    %270 = arith.cmpi eq, %arg0, %c0_i32_78 : i32
    %271 = arith.extui %270 : i1 to i32
    %c0_i32_79 = arith.constant 0 : i32
    %272 = arith.cmpi ne, %271, %c0_i32_79 : i32
    scf.if %272 {
      %273 = arith.subf %0, %1 : vector<1x128xf32>
      %c0_80 = arith.constant 0 : index
      %c0_81 = arith.constant 0 : index
      %274 = vector.load %arg6[%c0_80, %c0_81] : memref<8x128xf32, #tpu.memory_space<vmem>>, vector<8x128xf32>
      %275 = arith.mulf %273, %273 : vector<1x128xf32>
      %276 = vector.broadcast %4 : f32 to vector<1x128xf32>
      %277 = arith.mulf %276, %275 : vector<1x128xf32>
      %278 = vector.broadcast %277 : vector<1x128xf32> to vector<8x128xf32>
      %279 = arith.addf %274, %278 : vector<8x128xf32>
      %c0_82 = arith.constant 0 : index
      %c0_83 = arith.constant 0 : index
      %280 = vector.load %arg6[%c0_82, %c0_83] : memref<8x128xf32, #tpu.memory_space<vmem>>, vector<8x128xf32>
      tpu.vector_store %arg6[%c0_82, %c0_83], %279 {strides = array<i32>} : memref<8x128xf32, #tpu.memory_space<vmem>>, vector<8x128xf32>,
    } else {
    }
    return
  }
  func.func @transform_0(%arg0: i32, %arg1: i32) -> (i32, i32) {
    %c0_i32 = arith.constant 0 : i32
    %c0_i32_0 = arith.constant 0 : i32
    return %arg0, %c0_i32 : i32, i32
  }
  func.func @transform_1(%arg0: i32, %arg1: i32) -> (i32, i32) {
    %c0_i32 = arith.constant 0 : i32
    %c0_i32_0 = arith.constant 0 : i32
    return %arg0, %c0_i32 : i32, i32
  }
  func.func @transform_2(%arg0: i32, %arg1: i32) -> (i32, i32) {
    %c0_i32 = arith.constant 0 : i32
    %c0_i32_0 = arith.constant 0 : i32
    return %c0_i32, %arg1 : i32, i32
  }
  func.func @transform_3(%arg0: i32, %arg1: i32) -> (i32, i32) {
    %c0_i32 = arith.constant 0 : i32
    %c0_i32_0 = arith.constant 0 : i32
    return %c0_i32, %arg1 : i32, i32
  }
  func.func @transform_4(%arg0: i32, %arg1: i32) -> (i32, i32) {
    %c0_i32 = arith.constant 0 : i32
    %c0_i32_0 = arith.constant 0 : i32
    return %arg0, %c0_i32 : i32, i32
  }
}

</mosaic_0001>

<bundles_post_ra>
// kernel: tpu_custom_call.1
= control target key start
LH: loop header
LB: loop body
LE: loop exit
PB: predicated region body
PF: predicated region fallthrough
CT: control target
= control target key end

     0   :  { %v432_v2 = vmov 0   ;;  %s622_s0 = inlined_call_operand.vmem [shape: f32[128,1], index: 0, kind: input, shape index: {}]   ;;  %s623_s1 = inlined_call_operand.vmem [shape: f32[128,1], index: 1, kind: input, shape index: {}]   ;;  %s624_s2 = inlined_call_operand.vmem [shape: f32[1,128], index: 2, kind: input, shape index: {}]   ;;  %s625_s3 = inlined_call_operand.vmem [shape: f32[1,128], index: 3, kind: input, shape index: {}]   ;;  %s626_s4 = inlined_call_operand.hbm [shape: f32[8,128], index: 4, kind: output, shape index: {}]  }
   0x1   :  { %v373_v0 = vld [vmem:[%s622_s0 + $0x8] sm:$0xff]  ;;  %v25_v1 = vld [vmem:[%s622_s0] sm:$0xff]  ;;  %407 = vset.pattern.permute.xlu1 %v432_v2  ;;  %406 = vset.pattern.permute.xlu0 %v432_v2  ;;  %v376_v5 = vld [vmem:[%s623_s1 + $0x10] sm:$0xff] }
   0x2   :  { %60 = vperm.xlu1 %407, %v373_v0   ;;  %29 = vperm.xlu0 %406, %v25_v1   ;;  %v374_v3 = vld [vmem:[%s623_s1 + $0x8] sm:$0xff]  ;;  %v26_v4 = vld [vmem:[%s623_s1] sm:$0xff]  ;;  %v375_v6 = vld [vmem:[%s622_s0 + $0x10] sm:$0xff] }
   0x3   :  { %v378_v7 = vld [vmem:[%s623_s1 + $0x18] sm:$0xff] }
   0x4   :  { %v377_v8 = vld [vmem:[%s622_s0 + $0x18] sm:$0xff] }
   0x6   :  { %66 = vperm.xlu1 %407, %v374_v3   ;;  %47 = vperm.xlu0 %406, %v26_v4  }
   0xa   :  { %85 = vperm.xlu1 %407, %v376_v5   ;;  %79 = vperm.xlu0 %406, %v375_v6  }
   0xb   :  { %9 = vsyncpa [#allocation3], 0  ;;  %v380_v9 = vld [vmem:[%s623_s1 + $0x20] sm:$0xff]  ;;  %v382_v11 = vld [vmem:[%s623_s1 + $0x28] sm:$0xff]  ;;  %v33_v39 = vlaneseq }
   0xc   :  { %v379_v10 = vld [vmem:[%s622_s0 + $0x20] sm:$0xff]  ;;  %v381_v12 = vld [vmem:[%s622_s0 + $0x28] sm:$0xff]  ;;  %v384_v13 = vld [vmem:[%s623_s1 + $0x30] sm:$0xff] }
   0xd   :  { %v383_v14 = vld [vmem:[%s622_s0 + $0x30] sm:$0xff]  ;;  %v386_v15 = vld [vmem:[%s623_s1 + $0x38] sm:$0xff]  ;;  %v388_v17 = vld [vmem:[%s623_s1 + $0x40] sm:$0xff]  ;;  %v34_v42 = vshrl.u32 %v33_v39, 7 }
   0xe   :  { %104 = vperm.xlu1 %407, %v378_v7   ;;  %98 = vperm.xlu0 %406, %v377_v8   ;;  %v385_v16 = vld [vmem:[%s622_s0 + $0x38] sm:$0xff]  ;;  %v387_v18 = vld [vmem:[%s622_s0 + $0x40] sm:$0xff]  ;;  %v390_v19 = vld [vmem:[%s623_s1 + $0x48] sm:$0xff] }
   0xf   :  { %v389_v20 = vld [vmem:[%s622_s0 + $0x48] sm:$0xff]  ;;  %v392_v21 = vld [vmem:[%s623_s1 + $0x50] sm:$0xff]  ;;  %v394_v23 = vld [vmem:[%s623_s1 + $0x58] sm:$0xff]  ;;  %v560_v46 = vsub.s32 0, %v34_v42 }
  0x10   :  { %v391_v22 = vld [vmem:[%s622_s0 + $0x50] sm:$0xff]  ;;  %v393_v24 = vld [vmem:[%s622_s0 + $0x58] sm:$0xff]  ;;  %v396_v25 = vld [vmem:[%s623_s1 + $0x60] sm:$0xff] }
  0x11   :  { %v395_v26 = vld [vmem:[%s622_s0 + $0x60] sm:$0xff]  ;;  %v398_v27 = vld [vmem:[%s623_s1 + $0x68] sm:$0xff]  ;;  %v400_v29 = vld [vmem:[%s623_s1 + $0x70] sm:$0xff] }
  0x12   :  { %123 = vperm.xlu1 %407, %v380_v9   ;;  %117 = vperm.xlu0 %406, %v379_v10   ;;  %v397_v28 = vld [vmem:[%s622_s0 + $0x68] sm:$0xff]  ;;  %v399_v30 = vld [vmem:[%s622_s0 + $0x70] sm:$0xff]  ;;  %v402_v31 = vld [vmem:[%s623_s1 + $0x78] sm:$0xff] }
  0x13   :  { %v401_v32 = vld [vmem:[%s622_s0 + $0x78] sm:$0xff]  ;;  %v558_v45 = vld [vmem:[%s625_s3] sm:$0x1] }
  0x14   :  { %v565_v47 = vld [vmem:[%s624_s2] sm:$0x1]  ;;  %v569_v50 = vrot.slane %v558_v45, %v560_v46  ;;  %s433_s2 = smov [#allocation2]  }
  0x15   :  { %v573_v51 = vrot.slane %v565_v47, %v560_v46  ;;  %s365_s3 = sshll.u32 %s433_s2, 4  ;;  %s366_s3 = int_to_ptr.vmem [resolvable:$true] %s365_s3 }
  0x16   :  { %142 = vperm.xlu1 %407, %v382_v11   ;;  %136 = vperm.xlu0 %406, %v381_v12   ;;  %s408_s29 = scalar_lea.vmem %s366_s3, 128  ;;  %p413_p1 = scmp.lt.s32.totalorder %s366_s3, %s366_s3 }
  0x17   :  { %p409_p0 = scmp.ne.s32.totalorder %s366_s3, %s408_s29  ;;  %p414_p2 = scmp.lt.s32.totalorder %s408_s29, %s408_s29 }
  0x19   :  { %p415_p3 = por %p414_p2, %p413_p1 }
  0x1a   :  { %161 = vperm.xlu1 %407, %v384_v13   ;;  %155 = vperm.xlu0 %406, %v383_v14  }
  0x1b   :  { %p416_p4 = pnand %p415_p3, %p409_p0 }
  0x1e   :  { %180 = vperm.xlu1 %407, %v386_v15   ;;  %174 = vperm.xlu0 %406, %v385_v16  }
  0x22   :  { %199 = vperm.xlu1 %407, %v388_v17   ;;  %193 = vperm.xlu0 %406, %v387_v18  }
  0x26   :  { %218 = vperm.xlu1 %407, %v390_v19   ;;  %212 = vperm.xlu0 %406, %v389_v20  }
  0x2a   :  { %237 = vperm.xlu1 %407, %v392_v21   ;;  %231 = vperm.xlu0 %406, %v391_v22  }
  0x2e   :  { %256 = vperm.xlu1 %407, %v394_v23   ;;  %250 = vperm.xlu0 %406, %v393_v24  }
  0x32   :  { %275 = vperm.xlu1 %407, %v396_v25   ;;  %269 = vperm.xlu0 %406, %v395_v26  }
  0x36   :  { %294 = vperm.xlu1 %407, %v398_v27   ;;  %288 = vperm.xlu0 %406, %v397_v28  }
  0x3a   :  { %313 = vperm.xlu1 %407, %v400_v29   ;;  %307 = vperm.xlu0 %406, %v399_v30  }
  0x3e   :  { %332 = vperm.xlu1 %407, %v402_v31   ;;  %326 = vperm.xlu0 %406, %v401_v32  }
  0x81   :  { %v61_v33 = vpop.permute.xlu1 %60  ;;  %v30_v34 = vpop.permute.xlu0 %29 }
  0x82   :  { %v63_v56 = vsub.f32 %v61_v33, %v573_v51  ;;  %v38_v57 = vsub.f32 %v30_v34, %v573_v51 }
  0x85   :  { %v67_v35 = vpop.permute.xlu1 %66  ;;  %v48_v36 = vpop.permute.xlu0 %47 }
  0x86   :  { %v69_v54 = vsub.f32 %v569_v50, %v67_v35  ;;  %v50_v55 = vsub.f32 %v569_v50, %v48_v36 }
  0x88   :  { %v70_v62 = vmul.f32 %v69_v54, %v63_v56  ;;  %v51_v63 = vmul.f32 %v50_v55, %v38_v57 }
  0x89   :  { %v86_v37 = vpop.permute.xlu1 %85  ;;  %v80_v38 = vpop.permute.xlu0 %79 }
  0x8a   :  { %v88_v58 = vsub.f32 %v569_v50, %v86_v37  ;;  %v82_v59 = vsub.f32 %v80_v38, %v573_v51  ;;  %v71_v7 = vmax.f32 %v70_v62, 0.0  ;;  %v52_v8 = vmax.f32 %v51_v63, 0.0 }
  0x8c   :  { %v89_v2 = vmul.f32 %v88_v58, %v82_v59  ;;  %v72_v18 = vadd.f32 %v71_v7, %v52_v8 }
  0x8d   :  { %v105_v40 = vpop.permute.xlu1 %104  ;;  %v99_v41 = vpop.permute.xlu0 %98 }
  0x8e   :  { %v107_v0 = vsub.f32 %v569_v50, %v105_v40  ;;  %v101_v1 = vsub.f32 %v99_v41, %v573_v51  ;;  %v90_v12 = vmax.f32 %v89_v2, 0.0 }
  0x90   :  { %v108_v9 = vmul.f32 %v107_v0, %v101_v1  ;;  %v91_v23 = vadd.f32 %v90_v12, %v72_v18 }
  0x91   :  { %v124_v43 = vpop.permute.xlu1 %123  ;;  %v118_v44 = vpop.permute.xlu0 %117 }
  0x92   :  { %v126_v3 = vsub.f32 %v569_v50, %v124_v43  ;;  %v120_v4 = vsub.f32 %v118_v44, %v573_v51  ;;  %v109_v19 = vmax.f32 %v108_v9, 0.0 }
  0x94   :  { %v127_v13 = vmul.f32 %v126_v3, %v120_v4  ;;  %v110_v30 = vadd.f32 %v109_v19, %v91_v23 }
  0x95   :  { %v143_v48 = vpop.permute.xlu1 %142  ;;  %v137_v49 = vpop.permute.xlu0 %136 }
  0x96   :  { %v145_v10 = vsub.f32 %v569_v50, %v143_v48  ;;  %v139_v11 = vsub.f32 %v137_v49, %v573_v51  ;;  %v128_v24 = vmax.f32 %v127_v13, 0.0 }
  0x98   :  { %v146_v20 = vmul.f32 %v145_v10, %v139_v11  ;;  %v129_v35 = vadd.f32 %v128_v24, %v110_v30  ;;  %v347_v10 = vsub.f32 %v565_v47, %v558_v45 }
  0x99   :  { %v162_v52 = vpop.permute.xlu1 %161  ;;  %v156_v53 = vpop.permute.xlu0 %155 }
  0x9a   :  { %v164_v14 = vsub.f32 %v569_v50, %v162_v52  ;;  %v158_v15 = vsub.f32 %v156_v53, %v573_v51  ;;  %v147_v31 = vmax.f32 %v146_v20, 0.0  ;;  %v349_v20 = vmul.f32 %v347_v10, %v347_v10 }
  0x9c   :  { %v165_v25 = vmul.f32 %v164_v14, %v158_v15  ;;  %v148_v42 = vadd.f32 %v147_v31, %v129_v35 }
  0x9d   :  { %v181_v60 = vpop.permute.xlu1 %180  ;;  %v175_v61 = vpop.permute.xlu0 %174 }
  0x9e   :  { %v183_v21 = vsub.f32 %v569_v50, %v181_v60  ;;  %v177_v22 = vsub.f32 %v175_v61, %v573_v51  ;;  %v166_v36 = vmax.f32 %v165_v25, 0.0 }
  0xa0   :  { %v184_v32 = vmul.f32 %v183_v21, %v177_v22  ;;  %v167_v52 = vadd.f32 %v166_v36, %v148_v42 }
  0xa1   :  { %v200_v5 = vpop.permute.xlu1 %199  ;;  %v194_v6 = vpop.permute.xlu0 %193 }
  0xa2   :  { %v202_v26 = vsub.f32 %v569_v50, %v200_v5  ;;  %v196_v27 = vsub.f32 %v194_v6, %v573_v51  ;;  %v185_v43 = vmax.f32 %v184_v32, 0.0 }
  0xa4   :  { %v203_v37 = vmul.f32 %v202_v26, %v196_v27  ;;  %v186_v59 = vadd.f32 %v185_v43, %v167_v52  ;;  %v350_v27 = vmul.f32 0.0009765625, %v349_v20 }
  0xa5   :  { %v219_v16 = vpop.permute.xlu1 %218  ;;  %v213_v17 = vpop.permute.xlu0 %212 }
  0xa6   :  { %v221_v33 = vsub.f32 %v569_v50, %v219_v16  ;;  %v215_v34 = vsub.f32 %v213_v17, %v573_v51  ;;  %v204_v53 = vmax.f32 %v203_v37, 0.0  ;;  %v355_v30 = vrot.slane %v350_v27, %v560_v46 }
  0xa8   :  { %v222_v44 = vmul.f32 %v221_v33, %v215_v34  ;;  %v205_v62 = vadd.f32 %v204_v53, %v186_v59 }
  0xa9   :  { %v238_v28 = vpop.permute.xlu1 %237  ;;  %v232_v29 = vpop.permute.xlu0 %231 }
  0xaa   :  { %v240_v40 = vsub.f32 %v569_v50, %v238_v28  ;;  %v234_v41 = vsub.f32 %v232_v29, %v573_v51  ;;  %v223_v60 = vmax.f32 %v222_v44, 0.0 }
  0xac   :  { %v241_v56 = vmul.f32 %v240_v40, %v234_v41  ;;  %v224_v5 = vadd.f32 %v223_v60, %v205_v62 }
  0xad   :  { %v257_v38 = vpop.permute.xlu1 %256  ;;  %v251_v39 = vpop.permute.xlu0 %250 }
  0xae   :  { %v259_v48 = vsub.f32 %v569_v50, %v257_v38  ;;  %v253_v49 = vsub.f32 %v251_v39, %v573_v51  ;;  %v242_v1 = vmax.f32 %v241_v56, 0.0 }
  0xb0   :  { %v260_v61 = vmul.f32 %v259_v48, %v253_v49  ;;  %v243_v11 = vadd.f32 %v242_v1, %v224_v5 }
  0xb1   :  { %v276_v54 = vpop.permute.xlu1 %275  ;;  %v270_v55 = vpop.permute.xlu0 %269 }
  0xb2   :  { %v278_v57 = vsub.f32 %v569_v50, %v276_v54  ;;  %v272_v58 = vsub.f32 %v270_v55, %v573_v51  ;;  %v261_v6 = vmax.f32 %v260_v61, 0.0 }
  0xb4   :  { %v279_v2 = vmul.f32 %v278_v57, %v272_v58  ;;  %v262_v15 = vadd.f32 %v261_v6, %v243_v11 }
  0xb5   :  { %v295_v63 = vpop.permute.xlu1 %294  ;;  %v289_v0 = vpop.permute.xlu0 %288 }
  0xb6   :  { %v297_v3 = vsub.f32 %v569_v50, %v295_v63  ;;  %v291_v4 = vsub.f32 %v289_v0, %v573_v51  ;;  %v280_v12 = vmax.f32 %v279_v2, 0.0 }
  0xb8   :  { %v298_v7 = vmul.f32 %v297_v3, %v291_v4  ;;  %v281_v21 = vadd.f32 %v280_v12, %v262_v15 }
  0xb9   :  { %v314_v8 = vpop.permute.xlu1 %313  ;;  %v308_v9 = vpop.permute.xlu0 %307 }
  0xba   :  { %v316_v13 = vsub.f32 %v569_v50, %v314_v8  ;;  %v310_v14 = vsub.f32 %v308_v9, %v573_v51  ;;  %v299_v16 = vmax.f32 %v298_v7, 0.0 }
  0xbc   :  { %v317_v17 = vmul.f32 %v316_v13, %v310_v14  ;;  %v300_v25 = vadd.f32 %v299_v16, %v281_v21 }
  0xbd   :  { %v333_v18 = vpop.permute.xlu1 %332  ;;  %v327_v19 = vpop.permute.xlu0 %326 }
  0xbe   :  { %v318_v22 = vmax.f32 %v317_v17, 0.0  ;;  %v335_v23 = vsub.f32 %v569_v50, %v333_v18  ;;  %v329_v24 = vsub.f32 %v327_v19, %v573_v51 }
  0xc0   :  { %v336_v45 = vmul.f32 %v335_v23, %v329_v24  ;;  %v319_v47 = vadd.f32 %v318_v22, %v300_v25 }
  0xc2   :  { %v337_v26 = vmax.f32 %v336_v45, 0.0 }
  0xc4   :  { %v338_v28 = vadd.f32 %v337_v26, %v319_v47 }
  0xc6   :  { %v340_v29 = vmul.f32 0.0234375, %v338_v28 }
  0xc8   :  { %v357_v31 = vadd.f32 %v355_v30, %v340_v29 }
  0xca   :  { %358 = vst [vmem:[#allocation2] sm:$0xff] %v357_v31 }
  0xcb   :  { %419 = shalt.err (!%p416_p4)
}
  0xcc   :  { %s420_s6 = scalar_lea.hbm %s626_s4, 128 }
  0xcd   :  { %p421_p5 = scmp.ne.s32.totalorder %s626_s4, %s420_s6  ;;  %p424_p6 = scmp.lt.u32.totalorder %s420_s6, %s626_s4 }
  0xcf   :  { %p426_p7 = pnand %p424_p6, %p421_p5 }
  0xd1   :  { %429 = shalt.err (!%p426_p7)
}
  0xd2   :  { %368 = dma.vmem_to_hbm [thread:$0]  %s366_s3, 128, %s626_s4, [#allocation3]  }
  0xd3   :  { %430 = dma.done.wait [#allocation3], 128  }
  0xd4   :  { %431 = vsyncadd [#allocation3], 4294967168 }
  0xd5   :  { %372 = vsyncpa [#allocation3], 1 }

</bundles_post_ra>
